<compile_context>
chip_gen: v6e
topology: v6e:2x2x1
jax: 0.10.0
libtpu: 0.0.40
codegen_flags: <defaults>
</compile_context>

<pallas_src>
import jax
import jax.numpy as jnp
import numpy as np
from jax import lax
from jax.experimental import pallas as pl
from jax.experimental.pallas import tpu as pltpu

C_IN, C_OUT, KH, KW = 6, 10, 5, 5
BN_EPS = 1e-5
C_IN_P = 8                      # channels zero-padded to a full f32 sublane group
KW_P = 6                        # kw padded to even so kw-windows pair into 16-row bf16 tiles
PAIRS = KW_P // 2               # 3 kw-pairs per kh
K_P = KH * KW_P * C_IN_P        # padded im2col contraction size (240)


def _make_kernel(NB, W, HW_C):
    """Fused BN+ReLU+im2col+conv+ReLU kernel, closed over static geometry."""

    def kernel(x_ref, scale_ref, shift_ref, w_ref, b_ref, out_ref, p2_ref):
        # x_ref:       (NB, C_IN_P, HW_C) f32   flattened, zero-padded NCHW input chunk
        # scale/shift: (C_IN_P, 1) f32          folded BN scale / shift (zero padded)
        # w_ref:       (C_OUT, K_P) bf16        im2col conv weights (kw/channel zero padded)
        # b_ref:       (C_OUT, 1) f32           conv bias
        # out_ref:     (C_OUT, NB*HW_C) f32     conv output, image-major along lanes
        # p2_ref:      (K_P, HW_C) bf16         VMEM scratch: im2col matrix for one image
        scale = scale_ref[...]
        shift = shift_ref[...]
        w = w_ref[...]
        b = b_ref[...]

        def body(n, carry):
            # BatchNorm (eval) + ReLU; Dropout(0.8) is identity in eval mode.
            y = jnp.maximum(x_ref[n] * scale + shift, 0.0)              # (8, HW_C) f32
            # Pair each kw window with its kw+1 neighbour (shift-by-1 copy) so every
            # im2col store is a full 16-row, HW_C-lane, tile-aligned bf16 store.
            y_next = pltpu.roll(y, HW_C - 1, axis=1)                    # y[:, j+1]
            y16 = jnp.concatenate([y, y_next], axis=0)                  # (16, HW_C) f32
            for kh in range(KH):
                for p in range(PAIRS):
                    off = kh * W + 2 * p
                    # Explicit XLU lane rotation instead of lane-misaligned slices.
                    if off == 0:
                        win = y16
                    else:
                        win = pltpu.roll(y16, (HW_C - off) % HW_C, axis=1)  # y16[:, j+off]
                    row0 = (kh * PAIRS + p) * 16
                    p2_ref[row0:row0 + 16, :] = win.astype(jnp.bfloat16)
            # One bf16 MXU matmul (K = 240) per image; bias + ReLU
            # (the trailing torch.relu in the model is idempotent).
            acc = jnp.dot(w, p2_ref[...], preferred_element_type=jnp.float32)
            col = pl.multiple_of(n * HW_C, 128)
            out_ref[:, pl.ds(col, HW_C)] = jnp.maximum(acc + b, 0.0).astype(out_ref.dtype)
            return carry

        lax.fori_loop(0, NB, body, 0)

    return kernel


def model_forward(x_nchw, params):
    """x_nchw: (N, 6, H, W) f32 -> (N, 10, H-4, W-4) f32 (NCHW, like PyTorch)."""
    gamma, beta, run_mean, run_var, conv_w_oihw, conv_b = params
    N, C, H, W = x_nchw.shape
    assert C == C_IN and H >= KH and W >= KW
    Ho, Wo = H - KH + 1, W - KW + 1
    HW = H * W
    HW_C = ((HW + 127) // 128) * 128          # lane-padded flat spatial length

    # Batch chunking: >=2 chunks when N>=2 (v7x megacore), up to 32 images per chunk
    # to amortize per-grid-step overhead, capped by a VMEM budget.
    if N <= 1:
        NB = 1
    else:
        per_img_dbl = 2 * 4 * HW_C * (C_IN_P + C_OUT)   # double-buffered in+out bytes/img
        nb_cap = max(1, (12 * 1024 * 1024) // per_img_dbl)
        NB = max(1, min(32, nb_cap, (N + 1) // 2))
    num_chunks = -(-N // NB)
    N_pad = num_chunks * NB

    # Fold BN (eval mode) into per-channel scale/shift, zero-padded to C_IN_P.
    scale = (gamma / jnp.sqrt(run_var + BN_EPS)).astype(jnp.float32)
    shift = (beta - run_mean * scale).astype(jnp.float32)
    scale_p = jnp.pad(scale.reshape(C_IN, 1), ((0, C_IN_P - C_IN), (0, 0)))
    shift_p = jnp.pad(shift.reshape(C_IN, 1), ((0, C_IN_P - C_IN), (0, 0)))

    # Flatten spatial (free reshape), zero-pad batch -> N_pad, channels -> 8, spatial -> HW_C.
    x_flat = x_nchw.reshape(N, C_IN, HW).astype(jnp.float32)
    x_pad = jnp.pad(x_flat, ((0, N_pad - N), (0, C_IN_P - C_IN), (0, HW_C - HW)))

    # im2col weights: row (kh*KW_P + kw)*C_IN_P + c  <->  w[co, c, kh, kw]
    # (kw = 5 and c in {6,7} are zero padding). bf16 to match the bf16 im2col scratch.
    w_t = jnp.transpose(conv_w_oihw, (0, 2, 3, 1)).astype(jnp.float32)   # (C_OUT,KH,KW,C_IN)
    w_p = jnp.pad(w_t, ((0, 0), (0, 0), (0, KW_P - KW), (0, C_IN_P - C_IN)))
    w2 = w_p.reshape(C_OUT, K_P).astype(jnp.bfloat16)
    b_col = conv_b.reshape(C_OUT, 1).astype(jnp.float32)

    kernel = _make_kernel(NB, W, HW_C)

    out_full = pl.pallas_call(
        kernel,
        out_shape=jax.ShapeDtypeStruct((num_chunks, C_OUT, NB * HW_C), jnp.float32),
        grid_spec=pltpu.PrefetchScalarGridSpec(
            num_scalar_prefetch=0,
            grid=(num_chunks,),
            in_specs=[
                pl.BlockSpec((NB, C_IN_P, HW_C), lambda i: (i, 0, 0)),
                pl.BlockSpec((C_IN_P, 1), lambda i: (0, 0)),
                pl.BlockSpec((C_IN_P, 1), lambda i: (0, 0)),
                pl.BlockSpec((C_OUT, K_P), lambda i: (0, 0)),
                pl.BlockSpec((C_OUT, 1), lambda i: (0, 0)),
            ],
            out_specs=pl.BlockSpec((None, C_OUT, NB * HW_C), lambda i: (i, 0, 0)),
            scratch_shapes=[pltpu.VMEM((K_P, HW_C), jnp.bfloat16)],
        ),
        compiler_params=pltpu.CompilerParams(
            dimension_semantics=("parallel",),
            vmem_limit_bytes=32 * 1024 * 1024,
        ),
    )(x_pad, scale_p, shift_p, w2, b_col)

    # Layout plumbing only: un-interleave (chunk, image) -> batch, drop padding,
    # keep the VALID (Ho, Wo) window. Garbage from the lane/batch padding only ever
    # lands in positions sliced away here.
    out = out_full.reshape(num_chunks, C_OUT, NB, HW_C).transpose(0, 2, 1, 3)
    out = out.reshape(N_pad, C_OUT, HW_C)[:N, :, :HW]
    return out.reshape(N, C_OUT, H, W)[:, :, :Ho, :Wo]


def reference_forward(x_nchw, params):
    """Pure-JAX f32 reference (eval-mode semantics), for correctness checking."""
    gamma, beta, run_mean, run_var, conv_w_oihw, conv_b = params
    scale = gamma / jnp.sqrt(run_var + BN_EPS)
    shift = beta - run_mean * scale
    y = x_nchw * scale[None, :, None, None] + shift[None, :, None, None]
    y = jnp.maximum(y, 0.0)  # dropout = identity (eval)
    out = jax.lax.conv_general_dilated(
        y, conv_w_oihw, window_strides=(1, 1), padding="VALID",
        dimension_numbers=("NCHW", "OIHW", "NCHW"))
    out = out + conv_b[None, :, None, None]
    out = jnp.maximum(out, 0.0)
    return jnp.maximum(out, 0.0)


if __name__ == "__main__":
    key = jax.random.PRNGKey(0)
    k_x, k_g, k_b, k_w, k_cb = jax.random.split(key, 5)

    # Small shapes consistent with the module: batch=2, channels=6, spatial=16.
    N, H, W = 2, 16, 16
    x = jax.random.normal(k_x, (N, C_IN, H, W), dtype=jnp.float32)

    gamma = 1.0 + 0.1 * jax.random.normal(k_g, (C_IN,), dtype=jnp.float32)
    beta = 0.1 * jax.random.normal(k_b, (C_IN,), dtype=jnp.float32)
    run_mean = jnp.zeros((C_IN,), dtype=jnp.float32)   # BN default running stats
    run_var = jnp.ones((C_IN,), dtype=jnp.float32)
    fan_in = C_IN * KH * KW
    conv_w = jax.random.normal(k_w, (C_OUT, C_IN, KH, KW), dtype=jnp.float32) / np.sqrt(fan_in)
    conv_b = 0.1 * jax.random.normal(k_cb, (C_OUT,), dtype=jnp.float32)

    params = (gamma, beta, run_mean, run_var, conv_w, conv_b)

    out = jax.block_until_ready(model_forward(x, params))
    ref = jax.block_until_ready(reference_forward(x, params))

    assert out.shape == (N, C_OUT, H - KH + 1, W - KW + 1), out.shape
    # bf16 im2col/matmul intermediates -> relaxed tolerance vs the f32 reference.
    np.testing.assert_allclose(np.asarray(out), np.asarray(ref), rtol=2e-2, atol=2e-2)
    print("KERNEL_OK")
</pallas_src>

<mosaic_0001>
module attributes {stable_mosaic.version = 11 : i64} {
  func.func @kernel(%arg0: i32, %arg1: memref<1x8x256xf32, #tpu.memory_space<vmem>>, %arg2: memref<8x1xf32, #tpu.memory_space<vmem>>, %arg3: memref<8x1xf32, #tpu.memory_space<vmem>>, %arg4: memref<10x240xbf16, #tpu.memory_space<vmem>>, %arg5: memref<10x1xf32, #tpu.memory_space<vmem>>, %arg6: memref<1x10x256xf32, #tpu.memory_space<vmem>>, %arg7: memref<240x256xbf16, #tpu.memory_space<vmem>>) attributes {dimension_semantics = [#tpu.dimension_semantics<parallel>], iteration_bounds = array<i64: 2>, scalar_prefetch = 0 : i64, scratch_operands = 1 : i64, tpu.core_type = #tpu.core_type<tc>, window_params = [{transform_indices = @transform_0, window_bounds = array<i64: 1, 8, 256>}, {pipeline_mode = #tpu.pipeline_mode<synchronous>, transform_indices = @transform_1, window_bounds = array<i64: 8, 1>}, {pipeline_mode = #tpu.pipeline_mode<synchronous>, transform_indices = @transform_2, window_bounds = array<i64: 8, 1>}, {pipeline_mode = #tpu.pipeline_mode<synchronous>, transform_indices = @transform_3, window_bounds = array<i64: 10, 240>}, {pipeline_mode = #tpu.pipeline_mode<synchronous>, transform_indices = @transform_4, window_bounds = array<i64: 10, 1>}, {transform_indices = @transform_5, window_bounds = array<i64: 1, 10, 256>}]} {
    %c0 = arith.constant 0 : index
    %c0_0 = arith.constant 0 : index
    %0 = vector.load %arg2[%c0, %c0_0] : memref<8x1xf32, #tpu.memory_space<vmem>>, vector<8x1xf32>
    %c0_1 = arith.constant 0 : index
    %c0_2 = arith.constant 0 : index
    %1 = vector.load %arg3[%c0_1, %c0_2] : memref<8x1xf32, #tpu.memory_space<vmem>>, vector<8x1xf32>
    %c0_3 = arith.constant 0 : index
    %c0_4 = arith.constant 0 : index
    %2 = vector.load %arg4[%c0_3, %c0_4] : memref<10x240xbf16, #tpu.memory_space<vmem>>, vector<10x240xbf16>
    %c0_5 = arith.constant 0 : index
    %c0_6 = arith.constant 0 : index
    %3 = vector.load %arg5[%c0_5, %c0_6] : memref<10x1xf32, #tpu.memory_space<vmem>>, vector<10x1xf32>
    %c0_i32 = arith.constant 0 : i32
    %4 = arith.index_cast %c0_i32 : i32 to index
    %c0_7 = arith.constant 0 : index
    %c0_8 = arith.constant 0 : index
    %5 = vector.load %arg1[%4, %c0_7, %c0_8] : memref<1x8x256xf32, #tpu.memory_space<vmem>>, vector<1x8x256xf32>
    %6 = vector.shape_cast %5 : vector<1x8x256xf32> to vector<8x256xf32>
    %7 = vector.broadcast %0 : vector<8x1xf32> to vector<8x256xf32>
    %8 = arith.mulf %6, %7 : vector<8x256xf32>
    %9 = vector.broadcast %1 : vector<8x1xf32> to vector<8x256xf32>
    %10 = arith.addf %8, %9 : vector<8x256xf32>
    %cst = arith.constant 0.000000e+00 : f32
    %11 = vector.broadcast %cst : f32 to vector<8x256xf32>
    %12 = arith.maximumf %10, %11 : vector<8x256xf32>
    %c255_i32 = arith.constant 255 : i32
    %13 = tpu.dynamic_rotate %12 by %c255_i32 dim 1 : vector<8x256xf32>, i32 -> vector<8x256xf32>
    %14 = tpu.concatenate %12, %13 in 0 : vector<8x256xf32>, vector<8x256xf32> -> vector<16x256xf32>
    %15 = arith.truncf %14 : vector<16x256xf32> to vector<16x256xbf16>
    %c0_9 = arith.constant 0 : index
    %c0_10 = arith.constant 0 : index
    %16 = vector.load %arg7[%c0_9, %c0_10] : memref<240x256xbf16, #tpu.memory_space<vmem>>, vector<16x256xbf16>
    tpu.vector_store %arg7[%c0_9, %c0_10], %15 {strides = array<i32>} : memref<240x256xbf16, #tpu.memory_space<vmem>>, vector<16x256xbf16>,
    %c254_i32 = arith.constant 254 : i32
    %17 = tpu.dynamic_rotate %14 by %c254_i32 dim 1 : vector<16x256xf32>, i32 -> vector<16x256xf32>
    %18 = arith.truncf %17 : vector<16x256xf32> to vector<16x256xbf16>
    %c16 = arith.constant 16 : index
    %c0_11 = arith.constant 0 : index
    %19 = vector.load %arg7[%c16, %c0_11] : memref<240x256xbf16, #tpu.memory_space<vmem>>, vector<16x256xbf16>
    tpu.vector_store %arg7[%c16, %c0_11], %18 {strides = array<i32>} : memref<240x256xbf16, #tpu.memory_space<vmem>>, vector<16x256xbf16>,
    %c252_i32 = arith.constant 252 : i32
    %20 = tpu.dynamic_rotate %14 by %c252_i32 dim 1 : vector<16x256xf32>, i32 -> vector<16x256xf32>
    %21 = arith.truncf %20 : vector<16x256xf32> to vector<16x256xbf16>
    %c32 = arith.constant 32 : index
    %c0_12 = arith.constant 0 : index
    %22 = vector.load %arg7[%c32, %c0_12] : memref<240x256xbf16, #tpu.memory_space<vmem>>, vector<16x256xbf16>
    tpu.vector_store %arg7[%c32, %c0_12], %21 {strides = array<i32>} : memref<240x256xbf16, #tpu.memory_space<vmem>>, vector<16x256xbf16>,
    %c240_i32 = arith.constant 240 : i32
    %23 = tpu.dynamic_rotate %14 by %c240_i32 dim 1 : vector<16x256xf32>, i32 -> vector<16x256xf32>
    %24 = arith.truncf %23 : vector<16x256xf32> to vector<16x256xbf16>
    %c48 = arith.constant 48 : index
    %c0_13 = arith.constant 0 : index
    %25 = vector.load %arg7[%c48, %c0_13] : memref<240x256xbf16, #tpu.memory_space<vmem>>, vector<16x256xbf16>
    tpu.vector_store %arg7[%c48, %c0_13], %24 {strides = array<i32>} : memref<240x256xbf16, #tpu.memory_space<vmem>>, vector<16x256xbf16>,
    %c238_i32 = arith.constant 238 : i32
    %26 = tpu.dynamic_rotate %14 by %c238_i32 dim 1 : vector<16x256xf32>, i32 -> vector<16x256xf32>
    %27 = arith.truncf %26 : vector<16x256xf32> to vector<16x256xbf16>
    %c64 = arith.constant 64 : index
    %c0_14 = arith.constant 0 : index
    %28 = vector.load %arg7[%c64, %c0_14] : memref<240x256xbf16, #tpu.memory_space<vmem>>, vector<16x256xbf16>
    tpu.vector_store %arg7[%c64, %c0_14], %27 {strides = array<i32>} : memref<240x256xbf16, #tpu.memory_space<vmem>>, vector<16x256xbf16>,
    %c236_i32 = arith.constant 236 : i32
    %29 = tpu.dynamic_rotate %14 by %c236_i32 dim 1 : vector<16x256xf32>, i32 -> vector<16x256xf32>
    %30 = arith.truncf %29 : vector<16x256xf32> to vector<16x256xbf16>
    %c80 = arith.constant 80 : index
    %c0_15 = arith.constant 0 : index
    %31 = vector.load %arg7[%c80, %c0_15] : memref<240x256xbf16, #tpu.memory_space<vmem>>, vector<16x256xbf16>
    tpu.vector_store %arg7[%c80, %c0_15], %30 {strides = array<i32>} : memref<240x256xbf16, #tpu.memory_space<vmem>>, vector<16x256xbf16>,
    %c224_i32 = arith.constant 224 : i32
    %32 = tpu.dynamic_rotate %14 by %c224_i32 dim 1 : vector<16x256xf32>, i32 -> vector<16x256xf32>
    %33 = arith.truncf %32 : vector<16x256xf32> to vector<16x256xbf16>
    %c96 = arith.constant 96 : index
    %c0_16 = arith.constant 0 : index
    %34 = vector.load %arg7[%c96, %c0_16] : memref<240x256xbf16, #tpu.memory_space<vmem>>, vector<16x256xbf16>
    tpu.vector_store %arg7[%c96, %c0_16], %33 {strides = array<i32>} : memref<240x256xbf16, #tpu.memory_space<vmem>>, vector<16x256xbf16>,
    %c222_i32 = arith.constant 222 : i32
    %35 = tpu.dynamic_rotate %14 by %c222_i32 dim 1 : vector<16x256xf32>, i32 -> vector<16x256xf32>
    %36 = arith.truncf %35 : vector<16x256xf32> to vector<16x256xbf16>
    %c112 = arith.constant 112 : index
    %c0_17 = arith.constant 0 : index
    %37 = vector.load %arg7[%c112, %c0_17] : memref<240x256xbf16, #tpu.memory_space<vmem>>, vector<16x256xbf16>
    tpu.vector_store %arg7[%c112, %c0_17], %36 {strides = array<i32>} : memref<240x256xbf16, #tpu.memory_space<vmem>>, vector<16x256xbf16>,
    %c220_i32 = arith.constant 220 : i32
    %38 = tpu.dynamic_rotate %14 by %c220_i32 dim 1 : vector<16x256xf32>, i32 -> vector<16x256xf32>
    %39 = arith.truncf %38 : vector<16x256xf32> to vector<16x256xbf16>
    %c128 = arith.constant 128 : index
    %c0_18 = arith.constant 0 : index
    %40 = vector.load %arg7[%c128, %c0_18] : memref<240x256xbf16, #tpu.memory_space<vmem>>, vector<16x256xbf16>
    tpu.vector_store %arg7[%c128, %c0_18], %39 {strides = array<i32>} : memref<240x256xbf16, #tpu.memory_space<vmem>>, vector<16x256xbf16>,
    %c208_i32 = arith.constant 208 : i32
    %41 = tpu.dynamic_rotate %14 by %c208_i32 dim 1 : vector<16x256xf32>, i32 -> vector<16x256xf32>
    %42 = arith.truncf %41 : vector<16x256xf32> to vector<16x256xbf16>
    %c144 = arith.constant 144 : index
    %c0_19 = arith.constant 0 : index
    %43 = vector.load %arg7[%c144, %c0_19] : memref<240x256xbf16, #tpu.memory_space<vmem>>, vector<16x256xbf16>
    tpu.vector_store %arg7[%c144, %c0_19], %42 {strides = array<i32>} : memref<240x256xbf16, #tpu.memory_space<vmem>>, vector<16x256xbf16>,
    %c206_i32 = arith.constant 206 : i32
    %44 = tpu.dynamic_rotate %14 by %c206_i32 dim 1 : vector<16x256xf32>, i32 -> vector<16x256xf32>
    %45 = arith.truncf %44 : vector<16x256xf32> to vector<16x256xbf16>
    %c160 = arith.constant 160 : index
    %c0_20 = arith.constant 0 : index
    %46 = vector.load %arg7[%c160, %c0_20] : memref<240x256xbf16, #tpu.memory_space<vmem>>, vector<16x256xbf16>
    tpu.vector_store %arg7[%c160, %c0_20], %45 {strides = array<i32>} : memref<240x256xbf16, #tpu.memory_space<vmem>>, vector<16x256xbf16>,
    %c204_i32 = arith.constant 204 : i32
    %47 = tpu.dynamic_rotate %14 by %c204_i32 dim 1 : vector<16x256xf32>, i32 -> vector<16x256xf32>
    %48 = arith.truncf %47 : vector<16x256xf32> to vector<16x256xbf16>
    %c176 = arith.constant 176 : index
    %c0_21 = arith.constant 0 : index
    %49 = vector.load %arg7[%c176, %c0_21] : memref<240x256xbf16, #tpu.memory_space<vmem>>, vector<16x256xbf16>
    tpu.vector_store %arg7[%c176, %c0_21], %48 {strides = array<i32>} : memref<240x256xbf16, #tpu.memory_space<vmem>>, vector<16x256xbf16>,
    %c192_i32 = arith.constant 192 : i32
    %50 = tpu.dynamic_rotate %14 by %c192_i32 dim 1 : vector<16x256xf32>, i32 -> vector<16x256xf32>
    %51 = arith.truncf %50 : vector<16x256xf32> to vector<16x256xbf16>
    %c192 = arith.constant 192 : index
    %c0_22 = arith.constant 0 : index
    %52 = vector.load %arg7[%c192, %c0_22] : memref<240x256xbf16, #tpu.memory_space<vmem>>, vector<16x256xbf16>
    tpu.vector_store %arg7[%c192, %c0_22], %51 {strides = array<i32>} : memref<240x256xbf16, #tpu.memory_space<vmem>>, vector<16x256xbf16>,
    %c190_i32 = arith.constant 190 : i32
    %53 = tpu.dynamic_rotate %14 by %c190_i32 dim 1 : vector<16x256xf32>, i32 -> vector<16x256xf32>
    %54 = arith.truncf %53 : vector<16x256xf32> to vector<16x256xbf16>
    %c208 = arith.constant 208 : index
    %c0_23 = arith.constant 0 : index
    %55 = vector.load %arg7[%c208, %c0_23] : memref<240x256xbf16, #tpu.memory_space<vmem>>, vector<16x256xbf16>
    tpu.vector_store %arg7[%c208, %c0_23], %54 {strides = array<i32>} : memref<240x256xbf16, #tpu.memory_space<vmem>>, vector<16x256xbf16>,
    %c188_i32 = arith.constant 188 : i32
    %56 = tpu.dynamic_rotate %14 by %c188_i32 dim 1 : vector<16x256xf32>, i32 -> vector<16x256xf32>
    %57 = arith.truncf %56 : vector<16x256xf32> to vector<16x256xbf16>
    %c224 = arith.constant 224 : index
    %c0_24 = arith.constant 0 : index
    %58 = vector.load %arg7[%c224, %c0_24] : memref<240x256xbf16, #tpu.memory_space<vmem>>, vector<16x256xbf16>
    tpu.vector_store %arg7[%c224, %c0_24], %57 {strides = array<i32>} : memref<240x256xbf16, #tpu.memory_space<vmem>>, vector<16x256xbf16>,
    %c0_25 = arith.constant 0 : index
    %c0_26 = arith.constant 0 : index
    %59 = vector.load %arg7[%c0_25, %c0_26] : memref<240x256xbf16, #tpu.memory_space<vmem>>, vector<240x256xbf16>
    %cst_27 = arith.constant dense<0.000000e+00> : vector<10x256xf32>
    %60 = tpu.matmul %2, %59, %cst_27 {dimension_numbers = #tpu.dot_dimension_numbers<[1], [0], [0], [1], [0, 0, 1, 1], [], []>} : vector<10x240xbf16>, vector<240x256xbf16>, vector<10x256xf32> -> vector<10x256xf32>
    %c256_i32 = arith.constant 256 : i32
    %61 = arith.muli %c0_i32, %c256_i32 : i32
    %62 = tpu.assume_multiple %61, 128 : i32
    %63 = vector.broadcast %3 : vector<10x1xf32> to vector<10x256xf32>
    %64 = arith.addf %60, %63 : vector<10x256xf32>
    %cst_28 = arith.constant 0.000000e+00 : f32
    %65 = vector.broadcast %cst_28 : f32 to vector<10x256xf32>
    %66 = arith.maximumf %64, %65 : vector<10x256xf32>
    %c0_29 = arith.constant 0 : index
    %c0_30 = arith.constant 0 : index
    %67 = arith.index_cast %62 : i32 to index
    %68 = vector.load %arg6[%c0_29, %c0_30, %67] : memref<1x10x256xf32, #tpu.memory_space<vmem>>, vector<1x10x256xf32>
    %69 = vector.shape_cast %68 : vector<1x10x256xf32> to vector<10x256xf32>
    %70 = vector.shape_cast %66 : vector<10x256xf32> to vector<1x10x256xf32>
    tpu.vector_store %arg6[%c0_29, %c0_30, %67], %70 {strides = array<i32>} : memref<1x10x256xf32, #tpu.memory_space<vmem>>, vector<1x10x256xf32>,
    %c1_i32 = arith.constant 1 : i32
    return
  }
  func.func @transform_0(%arg0: i32) -> (i32, i32, i32) {
    %c0_i32 = arith.constant 0 : i32
    %c0_i32_0 = arith.constant 0 : i32
    %c0_i32_1 = arith.constant 0 : i32
    return %arg0, %c0_i32, %c0_i32_0 : i32, i32, i32
  }
  func.func @transform_1(%arg0: i32) -> (i32, i32) {
    %c0_i32 = arith.constant 0 : i32
    %c0_i32_0 = arith.constant 0 : i32
    %c0_i32_1 = arith.constant 0 : i32
    return %c0_i32, %c0_i32_0 : i32, i32
  }
  func.func @transform_2(%arg0: i32) -> (i32, i32) {
    %c0_i32 = arith.constant 0 : i32
    %c0_i32_0 = arith.constant 0 : i32
    %c0_i32_1 = arith.constant 0 : i32
    return %c0_i32, %c0_i32_0 : i32, i32
  }
  func.func @transform_3(%arg0: i32) -> (i32, i32) {
    %c0_i32 = arith.constant 0 : i32
    %c0_i32_0 = arith.constant 0 : i32
    %c0_i32_1 = arith.constant 0 : i32
    return %c0_i32, %c0_i32_0 : i32, i32
  }
  func.func @transform_4(%arg0: i32) -> (i32, i32) {
    %c0_i32 = arith.constant 0 : i32
    %c0_i32_0 = arith.constant 0 : i32
    %c0_i32_1 = arith.constant 0 : i32
    return %c0_i32, %c0_i32_0 : i32, i32
  }
  func.func @transform_5(%arg0: i32) -> (i32, i32, i32) {
    %c0_i32 = arith.constant 0 : i32
    %c0_i32_0 = arith.constant 0 : i32
    %c0_i32_1 = arith.constant 0 : i32
    return %arg0, %c0_i32, %c0_i32_0 : i32, i32, i32
  }
}

</mosaic_0001>

<bundles_post_ra>
// kernel: tpu_custom_call.1
= control target key start
LH: loop header
LB: loop body
LE: loop exit
PB: predicated region body
PF: predicated region fallthrough
CT: control target
= control target key end

     0   :  { %10 = vsyncpa [#allocation4], 0  ;;  %s1399_s18 = smov 0   ;;  %s1497_s0 = inlined_call_operand.vmem [shape: f32[2,8,256], index: 0, kind: input, shape index: {}]   ;;  %s1498_s1 = inlined_call_operand.vmem [shape: f32[8,1], index: 1, kind: input, shape index: {}]   ;;  %s1499_s2 = inlined_call_operand.vmem [shape: f32[8,1], index: 2, kind: input, shape index: {}]   ;;  %s1500_s3 = inlined_call_operand.hbm [shape: bf16[10,240], index: 3, kind: input, shape index: {}]   ;;  %s1501_s4 = inlined_call_operand.vmem [shape: f32[10,1], index: 4, kind: input, shape index: {}]   ;;  %s1502_s5 = inlined_call_operand.vmem [shape: f32[2,10,256], index: 5, kind: output, shape index: {}]  }
   0x1 LB: > { %s1405_s19 = sadd.s32 4294967295, %s1348_s18   ;;  %p989_p0 = scmp.ge.s32.totalorder %s1348_s18, 1  ;;  %s1348_s18 = sphi %s1399_s18, %s16_s18  }
   0x2   : > { %p157_p1 = scmp.lt.s32.totalorder %s1348_s18, 3  ;;  %s1350_s20 = smov [#allocation3]  }
   0x3   : > { %s175_s21 = sshll.u32 %s1350_s20, 4  ;;  %p1133_p3 = scmp.eq.s32.totalorder %s1405_s19, 0  ;;  %s176_s21 = int_to_ptr.vmem [resolvable:$true] %s175_s21 }
   0x4   : > { %p1409_p2 = pnand %p989_p0, %p157_p1  ;;  %s1323_s23 = scalar_lea.vmem %s176_s21, 256 }
   0x5   : > { %p1324_p7 = scmp.ne.s32.totalorder %s176_s21, %s1323_s23  ;;  %p1331_p10 = scmp.lt.s32.totalorder %s176_s21, %s176_s21 }
   0x6   : > { %p1129_p4 = pneg %p1409_p2  ;;  %p1332_p11 = scmp.lt.s32.totalorder %s1323_s23, %s1323_s23 }
   0x8   : > { %p1130_p5 = pnand %p1133_p3, %p1129_p4  ;;  %p1333_p12 = por %p1332_p11, %p1331_p10 }
   0xa   : > { %p1314_p6 = pneg %p1130_p5 }
   0xc   : > { %p1326_p8 = pnand %p1324_p7, %p1314_p6 }
   0xe   : > { %p1327_p9 = pneg %p1326_p8 }
  0x10   : > { %p1334_p13 = pnand %p1333_p12, %p1327_p9 }
  0x12   : > { %1337 = shalt.err (!%p1334_p13)
}
  0x13   : > { %s1351_s24 = smov 128   ;;  %s1352_s25 = smov 8  }
  0x14   : > { %1132 = dma.hbm_to_vmem [thread:$0]  (!%p1130_p5), %s1500_s3, 256, %s176_s21, [#allocation4], %s1351_s24, %s1351_s24, %s1352_s25  }
  0x15   : > { %202 = sbr.rel (%p1409_p2) target bundleno = 667 (0x29b), region = 40 }
  0x1a   : > { %1343 = dma.done.wait (%p1133_p3), [#allocation4], 256  }
  0x1b   : > { %1345 = vsyncadd (%p1133_p3), [#allocation4], 4294967040  ;;  %v1353_v0 = vmov 0   ;;  %v241_v1 = vld [vmem:[%s1498_s1] sm:$0xff]  ;;  %p230_p0 = scmp.lt.s32.totalorder %s1405_s19, 1  ;;  %s1354_s11 = smov 127   ;;  %v269_v14 = vlaneseq }
  0x1c   : > { %1162 = vset.pattern.permute.xlu0 %v1353_v0  ;;  %1308 = vset.pattern.permute.xlu1 %v1353_v0  ;;  %v242_v2 = vld [vmem:[%s1499_s2] sm:$0xff]  ;;  %s1355_s12 = smov 94   ;;  %s1356_s13 = smov 96   ;;  %vm865_vm1 = vcmask 916480   ;;  %v246_v24 = vld [vmem:[%s1501_s4 + $0x8] sm:$0x3] }
  0x1d   : > { %251 = vperm.xlu0 %1162, %v241_v1   ;;  %s1505_s19 = smov (!%p230_p0, %s1405_s19), 1  ;;  %v1447_v15 = vand.u32 127, %v269_v14  ;;  %s1357_s14 = smov 108   ;;  %v1311_v23 = vld [vmem:[#allocation3 + $0x4] ss:$8 sps:$4 sm:$0x1f]  }
  0x1e   : > { %s1063_s7 = sshll.u32 %s1505_s19, 4  ;;  %s1358_s15 = smov 110   ;;  %1060 = vmatprep.mubr.msk.bf16.mxu0 %vm865_vm1, %v1311_v23  ;;  %v245_v25 = vld [vmem:[%s1501_s4] sm:$0xff] }
  0x1f   : > { %s234_s10 = scalar_lea.vmem %s1497_s0, %s1063_s7  ;;  %vm271_vm0 = vcmp.lt.s32.totalorder %v1447_v15, 127  ;;  %s1359_s16 = smov 112   ;;  %vm458_vm2 = vcmp.lt.s32.totalorder %v1447_v15, 94  ;;  %vm431_vm3 = vcmp.lt.s32.totalorder %v1447_v15, 96  ;;  %vm404_vm4 = vcmp.lt.s32.totalorder %v1447_v15, 108 }
  0x20   : > { %v247_v3 = vld [vmem:[%s234_s10] sm:$0xff]  ;;  %v248_v4 = vld [vmem:[%s234_s10 + $0x8] sm:$0xff]  ;;  %s1360_s17 = smov 124   ;;  %s1361_s20 = smov 126   ;;  %vm377_vm5 = vcmp.lt.s32.totalorder %v1447_v15, 110  ;;  %vm350_vm6 = vcmp.lt.s32.totalorder %v1447_v15, 112 }
  0x21   : > { %258 = vperm.xlu0 %1162, %v242_v2   ;;  %s1362_s21 = smov 60   ;;  %s1363_s22 = smov 62   ;;  %vm323_vm7 = vcmp.lt.s32.totalorder %v1447_v15, 124  ;;  %vm296_vm8 = vcmp.lt.s32.totalorder %v1447_v15, 126  ;;  %vm647_vm9 = vcmp.lt.s32.totalorder %v1447_v15, 60  ;;  %vm620_vm10 = vcmp.lt.s32.totalorder %v1447_v15, 62 }
  0x22   : > { %s1364_s23 = smov 64   ;;  %s1365_s24 = smov 76   ;;  %vm593_vm11 = vcmp.lt.s32.totalorder %v1447_v15, 64  ;;  %vm566_vm12 = vcmp.lt.s32.totalorder %v1447_v15, 76  ;;  %vm539_vm13 = vcmp.lt.s32.totalorder %v1447_v15, 78  ;;  %vm512_vm14 = vcmp.lt.s32.totalorder %v1447_v15, 80 }
  0x23   : > { %s1366_s25 = smov 78   ;;  %s1367_s26 = smov 80   ;;  %vm485_vm15 = vcmp.lt.s32.totalorder %v1447_v15, 92 }
  0x24   : > { %s1368_s27 = smov 92   ;;  %s1064_s7 = sshll.u32 %s1505_s19, 5 }
  0x25   : > { %s239_s10 = scalar_lea.vmem %s1502_s5, %s1064_s7 }
  0x98   : > { %v252_v5 = vpop.permute.xlu0 %251 }
  0x99   : > { %v254_v6 = vmul.f32 %v252_v5, %v247_v3  ;;  %v255_v7 = vmul.f32 %v252_v5, %v248_v4 }
  0x9c   : > { %v259_v8 = vpop.permute.xlu0 %258 }
  0x9d   : > { %v261_v9 = vadd.f32 %v259_v8, %v254_v6  ;;  %v262_v10 = vadd.f32 %v259_v8, %v255_v7 }
  0x9f   : > { %v1441_v11 = vmax.f32 %v261_v9, 0.0  ;;  %v1443_v12 = vmax.f32 %v262_v10, 0.0 }
  0xa1   : > { %v1163_v13 = vpack.i.bf16 %v1443_v12, %v1441_v11 }
  0xa3   : > { %1164 = vrot.lane.b32.xlu1 %v1163_v13, %s1354_s11 }
 0x115   : > { %v1165_v16 = vpop.permute.xlu1 %1164 }
 0x116   : > { %v1167_v17 = vunpack.i.h.bf16 %v1165_v16  ;;  %v1166_v18 = vunpack.i.l.bf16 %v1165_v16 }
 0x118   : > { %v1450_v19 = vsel %vm271_vm0, %v1166_v18, %v1167_v17  ;;  %v1452_v20 = vsel %vm271_vm0, %v1167_v17, %v1166_v18 }
 0x119   : > { %v1173_v21 = vpack.i.bf16 %v1452_v20, %v1443_v12  ;;  %v1168_v22 = vpack.i.bf16 %v1450_v19, %v1441_v11 }
 0x11b   : > { %1174 = vrot.lane.b32.xlu0 %v1173_v21, %s1355_s12  ;;  %1169 = vrot.lane.b32.xlu1 %v1168_v22, %s1355_s12 }
 0x11f   : > { %1184 = vrot.lane.b32.xlu0 %v1173_v21, %s1356_s13  ;;  %1179 = vrot.lane.b32.xlu1 %v1168_v22, %s1356_s13 }
 0x123   : > { %1194 = vrot.lane.b32.xlu0 %v1173_v21, %s1357_s14  ;;  %1189 = vrot.lane.b32.xlu1 %v1168_v22, %s1357_s14 }
 0x127   : > { %1204 = vrot.lane.b32.xlu0 %v1173_v21, %s1358_s15  ;;  %1199 = vrot.lane.b32.xlu1 %v1168_v22, %s1358_s15 }
 0x12b   : > { %1214 = vrot.lane.b32.xlu0 %v1173_v21, %s1359_s16  ;;  %1209 = vrot.lane.b32.xlu1 %v1168_v22, %s1359_s16 }
 0x12f   : > { %1224 = vrot.lane.b32.xlu0 %v1173_v21, %s1360_s17  ;;  %1219 = vrot.lane.b32.xlu1 %v1168_v22, %s1360_s17 }
 0x133   : > { %1234 = vrot.lane.b32.xlu0 %v1173_v21, %s1361_s20  ;;  %1229 = vrot.lane.b32.xlu1 %v1168_v22, %s1361_s20 }
 0x137   : > { %1244 = vrot.lane.b32.xlu0 %v1173_v21, %s1362_s21  ;;  %1239 = vrot.lane.b32.xlu1 %v1168_v22, %s1362_s21 }
 0x13b   : > { %1254 = vrot.lane.b32.xlu0 %v1173_v21, %s1363_s22  ;;  %1249 = vrot.lane.b32.xlu1 %v1168_v22, %s1363_s22 }
 0x13f   : > { %1264 = vrot.lane.b32.xlu0 %v1173_v21, %s1364_s23  ;;  %1259 = vrot.lane.b32.xlu1 %v1168_v22, %s1364_s23 }
 0x143   : > { %1274 = vrot.lane.b32.xlu0 %v1173_v21, %s1365_s24  ;;  %1269 = vrot.lane.b32.xlu1 %v1168_v22, %s1365_s24 }
 0x147   : > { %1284 = vrot.lane.b32.xlu0 %v1173_v21, %s1366_s25  ;;  %1279 = vrot.lane.b32.xlu1 %v1168_v22, %s1366_s25 }
 0x14b   : > { %1294 = vrot.lane.b32.xlu0 %v1173_v21, %s1367_s26  ;;  %1289 = vrot.lane.b32.xlu1 %v1168_v22, %s1367_s26 }
 0x14f   : > { %1304 = vrot.lane.b32.xlu0 %v1173_v21, %s1368_s27  ;;  %1299 = vrot.lane.b32.xlu1 %v1168_v22, %s1368_s27 }
 0x153   : > { %703 = vperm.xlu0 %1162, %v246_v24   ;;  %698 = vperm.xlu1 %1308, %v245_v25  }
 0x18d   : > { %v1175_v26 = vpop.permute.xlu0 %1174  ;;  %v1170_v27 = vpop.permute.xlu1 %1169 }
 0x18e   : > { %v1177_v28 = vunpack.i.h.bf16 %v1175_v26  ;;  %v1176_v29 = vunpack.i.l.bf16 %v1175_v26  ;;  %v1172_v30 = vunpack.i.h.bf16 %v1170_v27  ;;  %v1171_v31 = vunpack.i.l.bf16 %v1170_v27 }
 0x190   : > { %v461_v32 = vsel %vm458_vm2, %v1176_v29, %v1171_v31  ;;  %v462_v33 = vsel %vm458_vm2, %v1177_v28, %v1172_v30  ;;  %v459_v34 = vsel %vm458_vm2, %v1171_v31, %v1176_v29  ;;  %v460_v35 = vsel %vm458_vm2, %v1172_v30, %v1177_v28 }
 0x191   : > { %v1185_v36 = vpop.permute.xlu0 %1184  ;;  %v1180_v37 = vpop.permute.xlu1 %1179  ;;  %v1110_v38 = vpack.c.bf16 %v462_v33, %v461_v32  ;;  %v1109_v39 = vpack.c.bf16 %v460_v35, %v459_v34 }
 0x192   : > { %v1187_v40 = vunpack.i.h.bf16 %v1185_v36  ;;  %v1186_v41 = vunpack.i.l.bf16 %v1185_v36  ;;  %v1182_v42 = vunpack.i.h.bf16 %v1180_v37  ;;  %v1181_v43 = vunpack.i.l.bf16 %v1180_v37 }
 0x193   : > { %869 = vmatprep.subr.bf16.mxu0 %v1110_v38 }
 0x194   : > { %870 = vmatpush1.bf16.msra.mxu0 %v1109_v39  ;;  %v434_v44 = vsel %vm431_vm3, %v1186_v41, %v1181_v43  ;;  %v435_v45 = vsel %vm431_vm3, %v1187_v40, %v1182_v42  ;;  %v432_v46 = vsel %vm431_vm3, %v1181_v43, %v1186_v41  ;;  %v433_v47 = vsel %vm431_vm3, %v1182_v42, %v1187_v40 }
 0x195   : > { %v1195_v48 = vpop.permute.xlu0 %1194  ;;  %v1190_v49 = vpop.permute.xlu1 %1189  ;;  %v1108_v50 = vpack.c.bf16 %v435_v45, %v434_v44  ;;  %v1107_v51 = vpack.c.bf16 %v433_v47, %v432_v46 }
 0x196   : > { %v1197_v52 = vunpack.i.h.bf16 %v1195_v48  ;;  %v1196_v53 = vunpack.i.l.bf16 %v1195_v48  ;;  %v1192_v54 = vunpack.i.h.bf16 %v1190_v49  ;;  %v1191_v55 = vunpack.i.l.bf16 %v1190_v49 }
 0x197   : > { %871 = vmatprep.subr.bf16.mxu0 %v1108_v50 }
 0x198   : > { %872 = vmatpush1.bf16.msra.mxu0 %v1107_v51  ;;  %v407_v56 = vsel %vm404_vm4, %v1196_v53, %v1191_v55  ;;  %v408_v57 = vsel %vm404_vm4, %v1197_v52, %v1192_v54  ;;  %v405_v58 = vsel %vm404_vm4, %v1191_v55, %v1196_v53  ;;  %v406_v59 = vsel %vm404_vm4, %v1192_v54, %v1197_v52 }
 0x199   : > { %v1205_v60 = vpop.permute.xlu0 %1204  ;;  %v1200_v61 = vpop.permute.xlu1 %1199  ;;  %v1106_v62 = vpack.c.bf16 %v408_v57, %v407_v56  ;;  %v1105_v63 = vpack.c.bf16 %v406_v59, %v405_v58  ;;  %v1096_v57 = vpack.c.bf16 %v1452_v20, %v1443_v12 }
 0x19a   : > { %v1207_v0 = vunpack.i.h.bf16 %v1205_v60  ;;  %v1206_v1 = vunpack.i.l.bf16 %v1205_v60  ;;  %v1202_v2 = vunpack.i.h.bf16 %v1200_v61  ;;  %v1201_v3 = vunpack.i.l.bf16 %v1200_v61 }
 0x19b   : > { %873 = vmatprep.subr.bf16.mxu0 %v1106_v62  ;;  %v1095_v62 = vpack.c.bf16 %v1450_v19, %v1441_v11 }
 0x19c   : > { %874 = vmatpush1.bf16.msra.mxu0 %v1105_v63  ;;  %v380_v4 = vsel %vm377_vm5, %v1206_v1, %v1201_v3  ;;  %v381_v5 = vsel %vm377_vm5, %v1207_v0, %v1202_v2  ;;  %v378_v6 = vsel %vm377_vm5, %v1201_v3, %v1206_v1  ;;  %v379_v7 = vsel %vm377_vm5, %v1202_v2, %v1207_v0 }
 0x19d   : > { %v1215_v8 = vpop.permute.xlu0 %1214  ;;  %v1210_v9 = vpop.permute.xlu1 %1209  ;;  %v1104_v10 = vpack.c.bf16 %v381_v5, %v380_v4  ;;  %v1103_v13 = vpack.c.bf16 %v379_v7, %v378_v6 }
 0x19e   : > { %v1217_v14 = vunpack.i.h.bf16 %v1215_v8  ;;  %v1216_v16 = vunpack.i.l.bf16 %v1215_v8  ;;  %v1212_v17 = vunpack.i.h.bf16 %v1210_v9  ;;  %v1211_v18 = vunpack.i.l.bf16 %v1210_v9 }
 0x19f   : > { %875 = vmatprep.subr.bf16.mxu0 %v1104_v10 }
 0x1a0   : > { %876 = vmatpush1.bf16.msra.mxu0 %v1103_v13  ;;  %v353_v21 = vsel %vm350_vm6, %v1216_v16, %v1211_v18  ;;  %v354_v22 = vsel %vm350_vm6, %v1217_v14, %v1212_v17  ;;  %v351_v23 = vsel %vm350_vm6, %v1211_v18, %v1216_v16  ;;  %v352_v24 = vsel %vm350_vm6, %v1212_v17, %v1217_v14 }
 0x1a1   : > { %v1225_v25 = vpop.permute.xlu0 %1224  ;;  %v1220_v26 = vpop.permute.xlu1 %1219  ;;  %v1102_v27 = vpack.c.bf16 %v354_v22, %v353_v21  ;;  %v1101_v28 = vpack.c.bf16 %v352_v24, %v351_v23 }
 0x1a2   : > { %v1227_v29 = vunpack.i.h.bf16 %v1225_v25  ;;  %v1226_v30 = vunpack.i.l.bf16 %v1225_v25  ;;  %v1222_v31 = vunpack.i.h.bf16 %v1220_v26  ;;  %v1221_v32 = vunpack.i.l.bf16 %v1220_v26 }
 0x1a3   : > { %877 = vmatprep.subr.bf16.mxu0 %v1102_v27 }
 0x1a4   : > { %878 = vmatpush1.bf16.msra.mxu0 %v1101_v28  ;;  %v326_v33 = vsel %vm323_vm7, %v1226_v30, %v1221_v32  ;;  %v327_v34 = vsel %vm323_vm7, %v1227_v29, %v1222_v31  ;;  %v324_v35 = vsel %vm323_vm7, %v1221_v32, %v1226_v30  ;;  %v325_v36 = vsel %vm323_vm7, %v1222_v31, %v1227_v29 }
 0x1a5   : > { %v1235_v37 = vpop.permute.xlu0 %1234  ;;  %v1230_v38 = vpop.permute.xlu1 %1229  ;;  %v1100_v39 = vpack.c.bf16 %v327_v34, %v326_v33  ;;  %v1099_v40 = vpack.c.bf16 %v325_v36, %v324_v35 }
 0x1a6   : > { %v1237_v41 = vunpack.i.h.bf16 %v1235_v37  ;;  %v1236_v42 = vunpack.i.l.bf16 %v1235_v37  ;;  %v1232_v43 = vunpack.i.h.bf16 %v1230_v38  ;;  %v1231_v44 = vunpack.i.l.bf16 %v1230_v38 }
 0x1a7   : > { %879 = vmatprep.subr.bf16.mxu0 %v1100_v39 }
 0x1a8   : > { %880 = vmatpush1.bf16.msra.mxu0 %v1099_v40  ;;  %v299_v45 = vsel %vm296_vm8, %v1236_v42, %v1231_v44  ;;  %v300_v46 = vsel %vm296_vm8, %v1237_v41, %v1232_v43  ;;  %v297_v47 = vsel %vm296_vm8, %v1231_v44, %v1236_v42  ;;  %v298_v48 = vsel %vm296_vm8, %v1232_v43, %v1237_v41 }
 0x1a9   : > { %v1245_v49 = vpop.permute.xlu0 %1244  ;;  %v1240_v50 = vpop.permute.xlu1 %1239  ;;  %v1098_v51 = vpack.c.bf16 %v300_v46, %v299_v45  ;;  %v1097_v52 = vpack.c.bf16 %v298_v48, %v297_v47 }
 0x1aa   : > { %v1247_v53 = vunpack.i.h.bf16 %v1245_v49  ;;  %v1246_v54 = vunpack.i.l.bf16 %v1245_v49  ;;  %v1242_v55 = vunpack.i.h.bf16 %v1240_v50  ;;  %v1241_v56 = vunpack.i.l.bf16 %v1240_v50 }
 0x1ab   : > { %881 = vmatprep.subr.bf16.mxu0 %v1098_v51 }
 0x1ac   : > { %882 = vmatpush1.bf16.msra.mxu0 %v1097_v52  ;;  %v650_v58 = vsel %vm647_vm9, %v1246_v54, %v1241_v56  ;;  %v651_v59 = vsel %vm647_vm9, %v1247_v53, %v1242_v55  ;;  %v648_v63 = vsel %vm647_vm9, %v1241_v56, %v1246_v54  ;;  %v649_v0 = vsel %vm647_vm9, %v1242_v55, %v1247_v53 }
 0x1ad   : > { %v1255_v60 = vpop.permute.xlu0 %1254  ;;  %v1250_v61 = vpop.permute.xlu1 %1249  ;;  %883 = vmatprep.subr.bf16.mxu0 %v1096_v57  ;;  %v1124_v5 = vpack.c.bf16 %v651_v59, %v650_v58  ;;  %v1123_v8 = vpack.c.bf16 %v649_v0, %v648_v63 }
 0x1ae   : > { %v1257_v1 = vunpack.i.h.bf16 %v1255_v60  ;;  %v1256_v2 = vunpack.i.l.bf16 %v1255_v60  ;;  %v1252_v3 = vunpack.i.h.bf16 %v1250_v61  ;;  %v1251_v4 = vunpack.i.l.bf16 %v1250_v61 }
 0x1b0   : > { %884 = vmatpush1.bf16.msra.mxu0 %v1095_v62  ;;  %v623_v12 = vsel %vm620_vm10, %v1256_v2, %v1251_v4  ;;  %v624_v20 = vsel %vm620_vm10, %v1257_v1, %v1252_v3  ;;  %v621_v9 = vsel %vm620_vm10, %v1251_v4, %v1256_v2  ;;  %v622_v10 = vsel %vm620_vm10, %v1252_v3, %v1257_v1 }
 0x1b1   : > { %v1265_v6 = vpop.permute.xlu0 %1264  ;;  %v1260_v7 = vpop.permute.xlu1 %1259  ;;  %887 = vmatprep.subr.bf16.mxu0 %v1124_v5  ;;  %v1122_v16 = vpack.c.bf16 %v624_v20, %v623_v12  ;;  %v1121_v23 = vpack.c.bf16 %v622_v10, %v621_v9 }
 0x1b2   : > { %v1267_v11 = vunpack.i.h.bf16 %v1265_v6  ;;  %v1266_v19 = vunpack.i.l.bf16 %v1265_v6  ;;  %v1262_v13 = vunpack.i.h.bf16 %v1260_v7  ;;  %v1261_v14 = vunpack.i.l.bf16 %v1260_v7 }
 0x1b4   : > { %888 = vmatpush2.bf16.msra.mxu0 %v1123_v8  ;;  %v596_v17 = vsel %vm593_vm11, %v1266_v19, %v1261_v14  ;;  %v597_v18 = vsel %vm593_vm11, %v1267_v11, %v1262_v13  ;;  %v594_v24 = vsel %vm593_vm11, %v1261_v14, %v1266_v19  ;;  %v595_v25 = vsel %vm593_vm11, %v1262_v13, %v1267_v11  ;;  %v1309_v8 = vld [vmem:[#allocation3] ss:$8 sps:$4 sm:$0x1f]  }
 0x1b5   : > { %v1275_v21 = vpop.permute.xlu0 %1274  ;;  %v1270_v22 = vpop.permute.xlu1 %1269  ;;  %889 = vmatprep.subr.bf16.mxu0 %v1122_v16  ;;  %v1120_v30 = vpack.c.bf16 %v597_v18, %v596_v17  ;;  %v1119_v35 = vpack.c.bf16 %v595_v25, %v594_v24 }
 0x1b6   : > { %v1277_v26 = vunpack.i.h.bf16 %v1275_v21  ;;  %v1276_v27 = vunpack.i.l.bf16 %v1275_v21  ;;  %v1272_v28 = vunpack.i.h.bf16 %v1270_v22  ;;  %v1271_v29 = vunpack.i.l.bf16 %v1270_v22 }
 0x1b8   : > { %890 = vmatpush2.bf16.msra.mxu0 %v1121_v23  ;;  %v569_v31 = vsel %vm566_vm12, %v1276_v27, %v1271_v29  ;;  %v570_v32 = vsel %vm566_vm12, %v1277_v26, %v1272_v28  ;;  %v567_v36 = vsel %vm566_vm12, %v1271_v29, %v1276_v27  ;;  %v568_v37 = vsel %vm566_vm12, %v1272_v28, %v1277_v26 }
 0x1b9   : > { %v1285_v33 = vpop.permute.xlu0 %1284  ;;  %v1280_v34 = vpop.permute.xlu1 %1279  ;;  %891 = vmatprep.subr.bf16.mxu0 %v1120_v30  ;;  %v1118_v42 = vpack.c.bf16 %v570_v32, %v569_v31  ;;  %v1117_v47 = vpack.c.bf16 %v568_v37, %v567_v36 }
 0x1ba   : > { %v1287_v38 = vunpack.i.h.bf16 %v1285_v33  ;;  %v1286_v39 = vunpack.i.l.bf16 %v1285_v33  ;;  %v1282_v40 = vunpack.i.h.bf16 %v1280_v34  ;;  %v1281_v41 = vunpack.i.l.bf16 %v1280_v34 }
 0x1bc   : > { %892 = vmatpush2.bf16.msra.mxu0 %v1119_v35  ;;  %v542_v43 = vsel %vm539_vm13, %v1286_v39, %v1281_v41  ;;  %v543_v44 = vsel %vm539_vm13, %v1287_v38, %v1282_v40  ;;  %v540_v48 = vsel %vm539_vm13, %v1281_v41, %v1286_v39  ;;  %v541_v49 = vsel %vm539_vm13, %v1282_v40, %v1287_v38 }
 0x1bd   : > { %v1295_v45 = vpop.permute.xlu0 %1294  ;;  %v1290_v46 = vpop.permute.xlu1 %1289  ;;  %893 = vmatprep.subr.bf16.mxu0 %v1118_v42  ;;  %v1116_v54 = vpack.c.bf16 %v543_v44, %v542_v43  ;;  %v1115_v59 = vpack.c.bf16 %v541_v49, %v540_v48 }
 0x1be   : > { %v1297_v50 = vunpack.i.h.bf16 %v1295_v45  ;;  %v1296_v51 = vunpack.i.l.bf16 %v1295_v45  ;;  %v1292_v52 = vunpack.i.h.bf16 %v1290_v46  ;;  %v1291_v53 = vunpack.i.l.bf16 %v1290_v46 }
 0x1c0   : > { %894 = vmatpush2.bf16.msra.mxu0 %v1117_v47  ;;  %v515_v55 = vsel %vm512_vm14, %v1296_v51, %v1291_v53  ;;  %v516_v56 = vsel %vm512_vm14, %v1297_v50, %v1292_v52  ;;  %v513_v1 = vsel %vm512_vm14, %v1291_v53, %v1296_v51  ;;  %v514_v2 = vsel %vm512_vm14, %v1292_v52, %v1297_v50 }
 0x1c1   : > { %v1305_v57 = vpop.permute.xlu0 %1304  ;;  %v1300_v58 = vpop.permute.xlu1 %1299  ;;  %895 = vmatprep.subr.bf16.mxu0 %v1116_v54  ;;  %v1114_v0 = vpack.c.bf16 %v516_v56, %v515_v55  ;;  %v1113_v5 = vpack.c.bf16 %v514_v2, %v513_v1 }
 0x1c2   : > { %v1307_v60 = vunpack.i.h.bf16 %v1305_v57  ;;  %v1306_v61 = vunpack.i.l.bf16 %v1305_v57  ;;  %v1302_v62 = vunpack.i.h.bf16 %v1300_v58  ;;  %v1301_v63 = vunpack.i.l.bf16 %v1300_v58 }
 0x1c4   : > { %896 = vmatpush2.bf16.msra.mxu0 %v1115_v59  ;;  %v488_v3 = vsel %vm485_vm15, %v1306_v61, %v1301_v63  ;;  %v489_v4 = vsel %vm485_vm15, %v1307_v60, %v1302_v62  ;;  %v486_v20 = vsel %vm485_vm15, %v1301_v63, %v1306_v61  ;;  %v487_v6 = vsel %vm485_vm15, %v1302_v62, %v1307_v60 }
 0x1c5   : > { %897 = vmatprep.subr.bf16.mxu0 %v1114_v0  ;;  %v1112_v12 = vpack.c.bf16 %v489_v4, %v488_v3  ;;  %v1111_v7 = vpack.c.bf16 %v487_v6, %v486_v20 }
 0x1c8   : > { %898 = vmatpush2.bf16.msra.mxu0 %v1113_v5 }
 0x1c9   : > { %899 = vmatprep.subr.bf16.mxu0 %v1112_v12 }
 0x1cc   : > { %900 = vmatpush2.bf16.msra.mxu0 %v1111_v7 }
 0x1ce   : > { %v699_v9 = vpop.permute.xlu1 %698  ;;  %v704_v14 = vpop.permute.xlu0 %703 }
 0x1cf   : > { %902 = vmatmul.mubr.bf16.vlgmr.msra.gmra.mxu0 %v1309_v8 }
 0x28f   : > { %v903_v10 = vpop.f32.mrf.mxu0 }
 0x290   : > { %v904_v15 = vadd.f32 %v903_v10, %v699_v9 }
 0x291   : > { %v905_v11 = vpop.f32.mrf.mxu0 }
 0x292   : > { %v912_v19 = vmax.f32 %v904_v15, 0.0  ;;  %v906_v13 = vadd.f32 %v905_v11, %v699_v9 }
 0x293   : > { %v907_v16 = vpop.f32.mrf.mxu0 }
 0x294   : > { %916 = vst [vmem:[%s239_s10] sm:$0xff] %v912_v19  ;;  %v913_v17 = vmax.f32 %v906_v13, 0.0  ;;  %v908_v18 = vadd.f32 %v907_v16, %v704_v14 }
 0x295   : > { %v909_v21 = vpop.f32.mrf.mxu0 }
 0x296   : > { %917 = vst [vmem:[%s239_s10 + $0x8] sm:$0xff] %v913_v17  ;;  %v914_v22 = vmax.f32 %v908_v18, 0.0  ;;  %v910_v23 = vadd.f32 %v909_v21, %v704_v14 }
 0x298   : > { %918 = vst [vmem:[%s239_s10 + $0x10] sm:$0x3] %v914_v22  ;;  %v915_v24 = vmax.f32 %v910_v23, 0.0 }
 0x29a   : > { %919 = vst [vmem:[%s239_s10 + $0x18] sm:$0x3] %v915_v24 }
 0x29b PF: > { %s16_s18 = sadd.s32 1, %s1348_s18  }
 0x29c   : > { %p13_p1 = scmp.ge.s32.totalorder %s16_s18, 4  }
 0x29e   :  { %15 = sbr.rel (!%p13_p1) target bundleno = 1 (0x1), region = 75 }
 0x2a3   :  { %941 = vsyncpa [#allocation4], 1 }
 0x2a4   :  { %943 = vsyncpa [#allocation4 + $0x1], 1 }

</bundles_post_ra>
